<compile_context>
chip_gen: v5e
topology: v5e:2x2
jax: 0.10.0
libtpu: 0.0.40
codegen_flags: <defaults>
</compile_context>

<pallas_src>
import functools

import jax
import jax.numpy as jnp
from jax.experimental import pallas as pl
from jax.experimental.pallas import tpu as pltpu


# ---------------------------------------------------------------------------
# Kernel: one full EncoderLayer (optionally + final LayerNorm) per batch elem.
# ---------------------------------------------------------------------------
def encoder_layer_kernel(x_ref,
                         wqkv_ref, bqkv_ref,           # fused QKV projection
                         wo_ref, bo_ref,               # out proj (H, E, D)
                         n1w_ref, n1b_ref,             # LayerNorm1
                         w1_ref, b1_ref, w2_ref, b2_ref,   # pointwise FFN
                         n2w_ref, n2b_ref,             # LayerNorm2
                         *rest,
                         n_heads, output_attention, fuse_final_norm,
                         compute_dtype, approx_recip):
    """new_x, A = MHA(x, x, x);  x = LN1(x + new_x)
       y = Conv2(ReLU(Conv1(x)));  out = LN2(x + y)   [; out = LN_final(out)]
       (dropout is identity -- eval mode)
    """
    # TODO(synk): attn_mask / tau / delta / cluster_dict / channel_dict are
    #             None in this Encoder call path and are not modeled here.
    idx = 0
    if fuse_final_norm:
        fnw_ref, fnb_ref = rest[0], rest[1]
        idx = 2
    y_ref = rest[idx]
    idx += 1
    attn_ref = rest[idx] if output_attention else None

    x = x_ref[0]                                   # (L, D) f32
    L, D = x.shape
    H = n_heads
    E = D // H
    scale = float(E) ** -0.5

    # --- fused Q/K/V projection: one wide-N MXU pass -----------------------
    x_c = x.astype(compute_dtype)
    qkv = jnp.dot(x_c, wqkv_ref[...],
                  preferred_element_type=jnp.float32) + bqkv_ref[...]   # (L, 3D)

    # --- per-head attention; accumulate straight into the output projection
    new_x = bo_ref[...]                            # (1, D) f32, broadcasts up
    for h in range(H):
        qh = qkv[:, h * E:(h + 1) * E].astype(compute_dtype)          # (L, E)
        kh = qkv[:, D + h * E:D + (h + 1) * E].astype(compute_dtype)
        vh = qkv[:, 2 * D + h * E:2 * D + (h + 1) * E].astype(compute_dtype)

        # contract on E directly (no explicit kh.T / XLU transpose)
        s = jax.lax.dot_general(qh, kh, (((1,), (1,)), ((), ())),
                                preferred_element_type=jnp.float32) * scale
        m = jnp.max(s, axis=-1, keepdims=True)
        p = jnp.exp(s - m)
        denom = jnp.sum(p, axis=-1, keepdims=True)
        if approx_recip:
            a = p * pl.reciprocal(denom, approx=True)   # EUP slot, ~free
        else:
            a = p / denom
        if output_attention:
            attn_ref[0, h] = a

        ov = jnp.dot(a.astype(compute_dtype), vh,
                     preferred_element_type=jnp.float32)               # (L, E)
        # out = concat_h(o_h) @ wo  ==  sum_h o_h @ wo[h*E:(h+1)*E, :]
        new_x = new_x + jnp.dot(ov.astype(compute_dtype), wo_ref[h],
                                preferred_element_type=jnp.float32)

    # --- residual + LayerNorm1 (f32) ---------------------------------------
    x1 = x + new_x
    mu1 = jnp.mean(x1, axis=-1, keepdims=True)
    var1 = jnp.mean((x1 - mu1) ** 2, axis=-1, keepdims=True)
    x1n = (x1 - mu1) * jax.lax.rsqrt(var1 + 1e-5) * n1w_ref[...] + n1b_ref[...]

    # --- FFN: Conv1d(k=1) -> ReLU -> Conv1d(k=1), residual, LayerNorm2 -----
    h1 = jnp.dot(x1n.astype(compute_dtype), w1_ref[...],
                 preferred_element_type=jnp.float32) + b1_ref[...]
    h1 = jnp.maximum(h1, 0.0)                      # activation = relu (f32)
    h2 = jnp.dot(h1.astype(compute_dtype), w2_ref[...],
                 preferred_element_type=jnp.float32) + b2_ref[...]
    x2 = x1n + h2
    mu2 = jnp.mean(x2, axis=-1, keepdims=True)
    var2 = jnp.mean((x2 - mu2) ** 2, axis=-1, keepdims=True)
    out = (x2 - mu2) * jax.lax.rsqrt(var2 + 1e-5) * n2w_ref[...] + n2b_ref[...]

    # --- fused final Encoder LayerNorm (last layer only) -------------------
    if fuse_final_norm:
        mu3 = jnp.mean(out, axis=-1, keepdims=True)
        var3 = jnp.mean((out - mu3) ** 2, axis=-1, keepdims=True)
        out = (out - mu3) * jax.lax.rsqrt(var3 + 1e-5) * fnw_ref[...] + fnb_ref[...]

    y_ref[0] = out


# ---------------------------------------------------------------------------
# Wrapper (pallas_call setup)
# ---------------------------------------------------------------------------
def encoder_layer_call(x, p, n_heads, *,
                       output_attention=True,
                       fuse_final_norm=False, final_norm=None,
                       compute_dtype=jnp.float32, approx_recip=False):
    B, L, D = x.shape
    F = p["w1"].shape[1]
    H = n_heads
    assert D % H == 0, "d_model must be divisible by n_heads"
    E = D // H
    cd = compute_dtype

    # weight layout prep (one-time, wrapper side):
    #   fused (D, 3D) QKV weight; wo reshaped head-major (H, E, D) so the
    #   kernel only indexes the leading axis (no lane slicing / concat).
    wqkv = jnp.concatenate([p["wq"], p["wk"], p["wv"]], axis=1).astype(cd)
    bqkv = jnp.concatenate([p["bq"], p["bk"], p["bv"]], axis=1)   # f32
    wo_h = p["wo"].reshape(H, E, D).astype(cd)
    w1 = p["w1"].astype(cd)
    w2 = p["w2"].astype(cd)

    mat = lambda r, c: pl.BlockSpec((r, c), lambda b: (0, 0))
    row = lambda c: pl.BlockSpec((1, c), lambda b: (0, 0))

    inputs = [x, wqkv, bqkv, wo_h, p["bo"],
              p["n1w"], p["n1b"], w1, p["b1"], w2, p["b2"],
              p["n2w"], p["n2b"]]
    in_specs = [
        pl.BlockSpec((1, L, D), lambda b: (b, 0, 0)),          # x
        mat(D, 3 * D), row(3 * D),                             # wqkv, bqkv
        pl.BlockSpec((H, E, D), lambda b: (0, 0, 0)),          # wo (head-major)
        row(D),                                                # bo
        row(D), row(D),                                        # norm1 w, b
        mat(D, F), row(F),                                     # ffn w1, b1
        mat(F, D), row(D),                                     # ffn w2, b2
        row(D), row(D),                                        # norm2 w, b
    ]
    if fuse_final_norm:
        inputs += [final_norm["w"], final_norm["b"]]
        in_specs += [row(D), row(D)]                           # final norm w, b

    if output_attention:
        out_shape = (jax.ShapeDtypeStruct((B, L, D), jnp.float32),
                     jax.ShapeDtypeStruct((B, H, L, L), jnp.float32))
        out_specs = (pl.BlockSpec((1, L, D), lambda b: (b, 0, 0)),
                     pl.BlockSpec((1, H, L, L), lambda b: (b, 0, 0, 0)))
    else:
        out_shape = jax.ShapeDtypeStruct((B, L, D), jnp.float32)
        out_specs = pl.BlockSpec((1, L, D), lambda b: (b, 0, 0))

    kernel = functools.partial(
        encoder_layer_kernel, n_heads=H,
        output_attention=output_attention, fuse_final_norm=fuse_final_norm,
        compute_dtype=cd, approx_recip=approx_recip)

    outs = pl.pallas_call(
        kernel,
        out_shape=out_shape,
        grid=(B,),
        in_specs=in_specs,
        out_specs=out_specs,
        compiler_params=pltpu.CompilerParams(
            dimension_semantics=("parallel",),
            vmem_limit_bytes=64 * 1024 * 1024),
    )(*inputs)

    if output_attention:
        return outs[0], outs[1]
    return outs, None


def encoder_forward(x, layer_params, norm_params, n_heads, *,
                    output_attention=True,
                    compute_dtype=jnp.float32, approx_recip=False):
    """Encoder.forward with conv_layers=None: stack of attn layers + final LN
    (final LN fused into the last layer's kernel)."""
    attns = []
    n = len(layer_params)
    for i, p in enumerate(layer_params):
        fuse = (i == n - 1) and (norm_params is not None)
        x, a = encoder_layer_call(
            x, p, n_heads,
            output_attention=output_attention,
            fuse_final_norm=fuse,
            final_norm=norm_params if fuse else None,
            compute_dtype=compute_dtype,
            approx_recip=approx_recip)
        attns.append(a)
    return x, attns


# ---------------------------------------------------------------------------
# Pure-JAX reference (for correctness check)
# ---------------------------------------------------------------------------
def _ln(x, w, b):
    mu = jnp.mean(x, axis=-1, keepdims=True)
    var = jnp.mean((x - mu) ** 2, axis=-1, keepdims=True)
    return (x - mu) * jax.lax.rsqrt(var + 1e-5) * w + b


def encoder_reference(x, layer_params, norm_params, n_heads):
    B, L, D = x.shape
    E = D // n_heads
    attns = []
    for p in layer_params:
        q = x @ p["wq"] + p["bq"]
        k = x @ p["wk"] + p["bk"]
        v = x @ p["wv"] + p["bv"]
        qh = q.reshape(B, L, n_heads, E).transpose(0, 2, 1, 3)
        kh = k.reshape(B, L, n_heads, E).transpose(0, 2, 1, 3)
        vh = v.reshape(B, L, n_heads, E).transpose(0, 2, 1, 3)
        s = jnp.einsum("bhld,bhsd->bhls", qh, kh) / jnp.sqrt(jnp.float32(E))
        a = jax.nn.softmax(s, axis=-1)
        o = jnp.einsum("bhls,bhsd->bhld", a, vh).transpose(0, 2, 1, 3).reshape(B, L, D)
        x1 = _ln(x + (o @ p["wo"] + p["bo"]), p["n1w"], p["n1b"])
        y = jnp.maximum(x1 @ p["w1"] + p["b1"], 0.0) @ p["w2"] + p["b2"]
        x = _ln(x1 + y, p["n2w"], p["n2b"])
        attns.append(a)
    x = _ln(x, norm_params["w"], norm_params["b"])
    return x, attns


# ---------------------------------------------------------------------------
# Deterministic parameter init
# ---------------------------------------------------------------------------
def init_params(key, num_layers, d_model, d_ff):
    layers = []
    for _ in range(num_layers):
        key, *ks = jax.random.split(key, 18)
        n = lambda k, shape: (0.05 * jax.random.normal(k, shape)).astype(jnp.float32)
        p = dict(
            wq=n(ks[0], (d_model, d_model)), bq=n(ks[1], (1, d_model)),
            wk=n(ks[2], (d_model, d_model)), bk=n(ks[3], (1, d_model)),
            wv=n(ks[4], (d_model, d_model)), bv=n(ks[5], (1, d_model)),
            wo=n(ks[6], (d_model, d_model)), bo=n(ks[7], (1, d_model)),
            n1w=jnp.ones((1, d_model), jnp.float32) + n(ks[8], (1, d_model)),
            n1b=n(ks[9], (1, d_model)),
            w1=n(ks[10], (d_model, d_ff)), b1=n(ks[11], (1, d_ff)),
            w2=n(ks[12], (d_ff, d_model)), b2=n(ks[13], (1, d_model)),
            n2w=jnp.ones((1, d_model), jnp.float32) + n(ks[14], (1, d_model)),
            n2b=n(ks[15], (1, d_model)),
        )
        layers.append(p)
    key, k1, k2 = jax.random.split(key, 3)
    norm = dict(
        w=jnp.ones((1, d_model), jnp.float32)
          + (0.05 * jax.random.normal(k1, (1, d_model))).astype(jnp.float32),
        b=(0.05 * jax.random.normal(k2, (1, d_model))).astype(jnp.float32),
    )
    return layers, norm


# ---------------------------------------------------------------------------
if __name__ == "__main__":
    B, L, D, H, FF, NLAYERS = 2, 8, 32, 4, 64, 2

    key = jax.random.PRNGKey(0)
    key, kx = jax.random.split(key)
    x = jax.random.normal(kx, (B, L, D), dtype=jnp.float32)

    layer_params, norm_params = init_params(key, NLAYERS, D, FF)
    ref_out, ref_attns = encoder_reference(x, layer_params, norm_params, H)

    # ---- f32 path, exact softmax divide, attention weights returned:
    #      bit-level check of the restructured kernel vs. the reference.
    out, attns = encoder_forward(x, layer_params, norm_params, H,
                                 output_attention=True,
                                 compute_dtype=jnp.float32,
                                 approx_recip=False)
    out = jax.block_until_ready(out)
    attns = [jax.block_until_ready(a) for a in attns]
    assert out.shape == (B, L, D)
    assert jnp.allclose(out, ref_out, atol=1e-4, rtol=1e-4)
    for a, ra in zip(attns, ref_attns):
        assert a.shape == (B, H, L, L)
        assert jnp.allclose(a, ra, atol=1e-4, rtol=1e-4)

    # ---- performance path: bf16 matmul inputs (f32 accumulate), EUP approx
    #      reciprocal in softmax, NO attention-weights output (saves the
    #      (B,H,L,L) VMEM block + HBM writeback).
    out_fast, attns_fast = encoder_forward(x, layer_params, norm_params, H,
                                           output_attention=False,
                                           compute_dtype=jnp.bfloat16,
                                           approx_recip=True)
    out_fast = jax.block_until_ready(out_fast)
    assert out_fast.shape == (B, L, D)
    assert all(a is None for a in attns_fast)
    assert bool(jnp.all(jnp.isfinite(out_fast)))
    assert jnp.allclose(out_fast, ref_out, atol=1e-1, rtol=1e-1)

    print("KERNEL_OK")
</pallas_src>

<mosaic_0001>
module attributes {stable_mosaic.version = 11 : i64} {
  func.func @encoder_layer_kernel(%arg0: i32, %arg1: memref<1x8x32xf32, #tpu.memory_space<vmem>>, %arg2: memref<32x96xf32, #tpu.memory_space<vmem>>, %arg3: memref<1x96xf32, #tpu.memory_space<vmem>>, %arg4: memref<4x8x32xf32, #tpu.memory_space<vmem>>, %arg5: memref<1x32xf32, #tpu.memory_space<vmem>>, %arg6: memref<1x32xf32, #tpu.memory_space<vmem>>, %arg7: memref<1x32xf32, #tpu.memory_space<vmem>>, %arg8: memref<32x64xf32, #tpu.memory_space<vmem>>, %arg9: memref<1x64xf32, #tpu.memory_space<vmem>>, %arg10: memref<64x32xf32, #tpu.memory_space<vmem>>, %arg11: memref<1x32xf32, #tpu.memory_space<vmem>>, %arg12: memref<1x32xf32, #tpu.memory_space<vmem>>, %arg13: memref<1x32xf32, #tpu.memory_space<vmem>>, %arg14: memref<1x8x32xf32, #tpu.memory_space<vmem>>, %arg15: memref<1x4x8x8xf32, #tpu.memory_space<vmem>>) attributes {dimension_semantics = [#tpu.dimension_semantics<parallel>], iteration_bounds = array<i64: 2>, scalar_prefetch = 0 : i64, scratch_operands = 0 : i64, tpu.core_type = #tpu.core_type<tc>, window_params = [{transform_indices = @transform_0, window_bounds = array<i64: 1, 8, 32>}, {pipeline_mode = #tpu.pipeline_mode<synchronous>, transform_indices = @transform_1, window_bounds = array<i64: 32, 96>}, {pipeline_mode = #tpu.pipeline_mode<synchronous>, transform_indices = @transform_2, window_bounds = array<i64: 1, 96>}, {pipeline_mode = #tpu.pipeline_mode<synchronous>, transform_indices = @transform_3, window_bounds = array<i64: 4, 8, 32>}, {pipeline_mode = #tpu.pipeline_mode<synchronous>, transform_indices = @transform_4, window_bounds = array<i64: 1, 32>}, {pipeline_mode = #tpu.pipeline_mode<synchronous>, transform_indices = @transform_5, window_bounds = array<i64: 1, 32>}, {pipeline_mode = #tpu.pipeline_mode<synchronous>, transform_indices = @transform_6, window_bounds = array<i64: 1, 32>}, {pipeline_mode = #tpu.pipeline_mode<synchronous>, transform_indices = @transform_7, window_bounds = array<i64: 32, 64>}, {pipeline_mode = #tpu.pipeline_mode<synchronous>, transform_indices = @transform_8, window_bounds = array<i64: 1, 64>}, {pipeline_mode = #tpu.pipeline_mode<synchronous>, transform_indices = @transform_9, window_bounds = array<i64: 64, 32>}, {pipeline_mode = #tpu.pipeline_mode<synchronous>, transform_indices = @transform_10, window_bounds = array<i64: 1, 32>}, {pipeline_mode = #tpu.pipeline_mode<synchronous>, transform_indices = @transform_11, window_bounds = array<i64: 1, 32>}, {pipeline_mode = #tpu.pipeline_mode<synchronous>, transform_indices = @transform_12, window_bounds = array<i64: 1, 32>}, {transform_indices = @transform_13, window_bounds = array<i64: 1, 8, 32>}, {transform_indices = @transform_14, window_bounds = array<i64: 1, 4, 8, 8>}]} {
    %c0 = arith.constant 0 : index
    %c0_0 = arith.constant 0 : index
    %c0_1 = arith.constant 0 : index
    %0 = vector.load %arg1[%c0, %c0_0, %c0_1] : memref<1x8x32xf32, #tpu.memory_space<vmem>>, vector<1x8x32xf32>
    %1 = vector.shape_cast %0 : vector<1x8x32xf32> to vector<8x32xf32>
    %c0_2 = arith.constant 0 : index
    %c0_3 = arith.constant 0 : index
    %2 = vector.load %arg2[%c0_2, %c0_3] : memref<32x96xf32, #tpu.memory_space<vmem>>, vector<32x96xf32>
    %cst = arith.constant dense<0.000000e+00> : vector<8x96xf32>
    %3 = tpu.matmul %1, %2, %cst {dimension_numbers = #tpu.dot_dimension_numbers<[1], [0], [0], [1], [0, 0, 1, 1], [], []>} : vector<8x32xf32>, vector<32x96xf32>, vector<8x96xf32> -> vector<8x96xf32>
    %c0_4 = arith.constant 0 : index
    %c0_5 = arith.constant 0 : index
    %4 = vector.load %arg3[%c0_4, %c0_5] : memref<1x96xf32, #tpu.memory_space<vmem>>, vector<1x96xf32>
    %5 = vector.broadcast %4 : vector<1x96xf32> to vector<8x96xf32>
    %6 = arith.addf %3, %5 : vector<8x96xf32>
    %c0_6 = arith.constant 0 : index
    %c0_7 = arith.constant 0 : index
    %7 = vector.load %arg5[%c0_6, %c0_7] : memref<1x32xf32, #tpu.memory_space<vmem>>, vector<1x32xf32>
    %8 = vector.extract_strided_slice %6 {offsets = [0, 0], sizes = [8, 8], strides = [1, 1]} : vector<8x96xf32> to vector<8x8xf32>
    %9 = vector.extract_strided_slice %6 {offsets = [0, 32], sizes = [8, 8], strides = [1, 1]} : vector<8x96xf32> to vector<8x8xf32>
    %10 = vector.extract_strided_slice %6 {offsets = [0, 64], sizes = [8, 8], strides = [1, 1]} : vector<8x96xf32> to vector<8x8xf32>
    %cst_8 = arith.constant dense<0.000000e+00> : vector<8x8xf32>
    %11 = tpu.matmul %8, %9, %cst_8 {dimension_numbers = #tpu.dot_dimension_numbers<[1], [1], [0], [0], [0, 0, 1, 0], [], []>} : vector<8x8xf32>, vector<8x8xf32>, vector<8x8xf32> -> vector<8x8xf32>
    %cst_9 = arith.constant 0.353553385 : f32
    %12 = vector.broadcast %cst_9 : f32 to vector<8x8xf32>
    %13 = arith.mulf %11, %12 : vector<8x8xf32>
    %cst_10 = arith.constant dense<0xFF800000> : vector<8xf32>
    %14 = vector.multi_reduction <maximumf>, %13, %cst_10 [1] : vector<8x8xf32> to vector<8xf32>
    %15 = vector.shape_cast %14 : vector<8xf32> to vector<8x1xf32>
    %16 = vector.broadcast %15 : vector<8x1xf32> to vector<8x8xf32>
    %17 = arith.subf %13, %16 : vector<8x8xf32>
    %18 = math.exp %17 : vector<8x8xf32>
    %cst_11 = arith.constant dense<0.000000e+00> : vector<8xf32>
    %19 = vector.multi_reduction <add>, %18, %cst_11 [1] : vector<8x8xf32> to vector<8xf32>
    %20 = vector.shape_cast %19 : vector<8xf32> to vector<8x1xf32>
    %21 = vector.broadcast %20 : vector<8x1xf32> to vector<8x8xf32>
    %22 = arith.divf %18, %21 : vector<8x8xf32>
    %c0_12 = arith.constant 0 : index
    %c0_13 = arith.constant 0 : index
    %c0_14 = arith.constant 0 : index
    %c0_15 = arith.constant 0 : index
    %23 = vector.load %arg15[%c0_12, %c0_13, %c0_14, %c0_15] : memref<1x4x8x8xf32, #tpu.memory_space<vmem>>, vector<1x1x8x8xf32>
    %24 = vector.shape_cast %23 : vector<1x1x8x8xf32> to vector<8x8xf32>
    %25 = vector.shape_cast %22 : vector<8x8xf32> to vector<1x1x8x8xf32>
    tpu.vector_store %arg15[%c0_12, %c0_13, %c0_14, %c0_15], %25 {strides = array<i32>} : memref<1x4x8x8xf32, #tpu.memory_space<vmem>>, vector<1x1x8x8xf32>,
    %cst_16 = arith.constant dense<0.000000e+00> : vector<8x8xf32>
    %26 = tpu.matmul %22, %10, %cst_16 {dimension_numbers = #tpu.dot_dimension_numbers<[1], [0], [0], [1], [0, 0, 1, 1], [], []>} : vector<8x8xf32>, vector<8x8xf32>, vector<8x8xf32> -> vector<8x8xf32>
    %c0_17 = arith.constant 0 : index
    %c0_18 = arith.constant 0 : index
    %c0_19 = arith.constant 0 : index
    %27 = vector.load %arg4[%c0_17, %c0_18, %c0_19] : memref<4x8x32xf32, #tpu.memory_space<vmem>>, vector<1x8x32xf32>
    %28 = vector.shape_cast %27 : vector<1x8x32xf32> to vector<8x32xf32>
    %cst_20 = arith.constant dense<0.000000e+00> : vector<8x32xf32>
    %29 = tpu.matmul %26, %28, %cst_20 {dimension_numbers = #tpu.dot_dimension_numbers<[1], [0], [0], [1], [0, 0, 1, 1], [], []>} : vector<8x8xf32>, vector<8x32xf32>, vector<8x32xf32> -> vector<8x32xf32>
    %30 = vector.broadcast %7 : vector<1x32xf32> to vector<8x32xf32>
    %31 = arith.addf %30, %29 : vector<8x32xf32>
    %32 = vector.extract_strided_slice %6 {offsets = [0, 8], sizes = [8, 8], strides = [1, 1]} : vector<8x96xf32> to vector<8x8xf32>
    %33 = vector.extract_strided_slice %6 {offsets = [0, 40], sizes = [8, 8], strides = [1, 1]} : vector<8x96xf32> to vector<8x8xf32>
    %34 = vector.extract_strided_slice %6 {offsets = [0, 72], sizes = [8, 8], strides = [1, 1]} : vector<8x96xf32> to vector<8x8xf32>
    %cst_21 = arith.constant dense<0.000000e+00> : vector<8x8xf32>
    %35 = tpu.matmul %32, %33, %cst_21 {dimension_numbers = #tpu.dot_dimension_numbers<[1], [1], [0], [0], [0, 0, 1, 0], [], []>} : vector<8x8xf32>, vector<8x8xf32>, vector<8x8xf32> -> vector<8x8xf32>
    %cst_22 = arith.constant 0.353553385 : f32
    %36 = vector.broadcast %cst_22 : f32 to vector<8x8xf32>
    %37 = arith.mulf %35, %36 : vector<8x8xf32>
    %cst_23 = arith.constant dense<0xFF800000> : vector<8xf32>
    %38 = vector.multi_reduction <maximumf>, %37, %cst_23 [1] : vector<8x8xf32> to vector<8xf32>
    %39 = vector.shape_cast %38 : vector<8xf32> to vector<8x1xf32>
    %40 = vector.broadcast %39 : vector<8x1xf32> to vector<8x8xf32>
    %41 = arith.subf %37, %40 : vector<8x8xf32>
    %42 = math.exp %41 : vector<8x8xf32>
    %cst_24 = arith.constant dense<0.000000e+00> : vector<8xf32>
    %43 = vector.multi_reduction <add>, %42, %cst_24 [1] : vector<8x8xf32> to vector<8xf32>
    %44 = vector.shape_cast %43 : vector<8xf32> to vector<8x1xf32>
    %45 = vector.broadcast %44 : vector<8x1xf32> to vector<8x8xf32>
    %46 = arith.divf %42, %45 : vector<8x8xf32>
    %c0_25 = arith.constant 0 : index
    %c1 = arith.constant 1 : index
    %c0_26 = arith.constant 0 : index
    %c0_27 = arith.constant 0 : index
    %47 = vector.load %arg15[%c0_25, %c1, %c0_26, %c0_27] : memref<1x4x8x8xf32, #tpu.memory_space<vmem>>, vector<1x1x8x8xf32>
    %48 = vector.shape_cast %47 : vector<1x1x8x8xf32> to vector<8x8xf32>
    %49 = vector.shape_cast %46 : vector<8x8xf32> to vector<1x1x8x8xf32>
    tpu.vector_store %arg15[%c0_25, %c1, %c0_26, %c0_27], %49 {strides = array<i32>} : memref<1x4x8x8xf32, #tpu.memory_space<vmem>>, vector<1x1x8x8xf32>,
    %cst_28 = arith.constant dense<0.000000e+00> : vector<8x8xf32>
    %50 = tpu.matmul %46, %34, %cst_28 {dimension_numbers = #tpu.dot_dimension_numbers<[1], [0], [0], [1], [0, 0, 1, 1], [], []>} : vector<8x8xf32>, vector<8x8xf32>, vector<8x8xf32> -> vector<8x8xf32>
    %c1_29 = arith.constant 1 : index
    %c0_30 = arith.constant 0 : index
    %c0_31 = arith.constant 0 : index
    %51 = vector.load %arg4[%c1_29, %c0_30, %c0_31] : memref<4x8x32xf32, #tpu.memory_space<vmem>>, vector<1x8x32xf32>
    %52 = vector.shape_cast %51 : vector<1x8x32xf32> to vector<8x32xf32>
    %cst_32 = arith.constant dense<0.000000e+00> : vector<8x32xf32>
    %53 = tpu.matmul %50, %52, %cst_32 {dimension_numbers = #tpu.dot_dimension_numbers<[1], [0], [0], [1], [0, 0, 1, 1], [], []>} : vector<8x8xf32>, vector<8x32xf32>, vector<8x32xf32> -> vector<8x32xf32>
    %54 = arith.addf %31, %53 : vector<8x32xf32>
    %55 = vector.extract_strided_slice %6 {offsets = [0, 16], sizes = [8, 8], strides = [1, 1]} : vector<8x96xf32> to vector<8x8xf32>
    %56 = vector.extract_strided_slice %6 {offsets = [0, 48], sizes = [8, 8], strides = [1, 1]} : vector<8x96xf32> to vector<8x8xf32>
    %57 = vector.extract_strided_slice %6 {offsets = [0, 80], sizes = [8, 8], strides = [1, 1]} : vector<8x96xf32> to vector<8x8xf32>
    %cst_33 = arith.constant dense<0.000000e+00> : vector<8x8xf32>
    %58 = tpu.matmul %55, %56, %cst_33 {dimension_numbers = #tpu.dot_dimension_numbers<[1], [1], [0], [0], [0, 0, 1, 0], [], []>} : vector<8x8xf32>, vector<8x8xf32>, vector<8x8xf32> -> vector<8x8xf32>
    %cst_34 = arith.constant 0.353553385 : f32
    %59 = vector.broadcast %cst_34 : f32 to vector<8x8xf32>
    %60 = arith.mulf %58, %59 : vector<8x8xf32>
    %cst_35 = arith.constant dense<0xFF800000> : vector<8xf32>
    %61 = vector.multi_reduction <maximumf>, %60, %cst_35 [1] : vector<8x8xf32> to vector<8xf32>
    %62 = vector.shape_cast %61 : vector<8xf32> to vector<8x1xf32>
    %63 = vector.broadcast %62 : vector<8x1xf32> to vector<8x8xf32>
    %64 = arith.subf %60, %63 : vector<8x8xf32>
    %65 = math.exp %64 : vector<8x8xf32>
    %cst_36 = arith.constant dense<0.000000e+00> : vector<8xf32>
    %66 = vector.multi_reduction <add>, %65, %cst_36 [1] : vector<8x8xf32> to vector<8xf32>
    %67 = vector.shape_cast %66 : vector<8xf32> to vector<8x1xf32>
    %68 = vector.broadcast %67 : vector<8x1xf32> to vector<8x8xf32>
    %69 = arith.divf %65, %68 : vector<8x8xf32>
    %c0_37 = arith.constant 0 : index
    %c2 = arith.constant 2 : index
    %c0_38 = arith.constant 0 : index
    %c0_39 = arith.constant 0 : index
    %70 = vector.load %arg15[%c0_37, %c2, %c0_38, %c0_39] : memref<1x4x8x8xf32, #tpu.memory_space<vmem>>, vector<1x1x8x8xf32>
    %71 = vector.shape_cast %70 : vector<1x1x8x8xf32> to vector<8x8xf32>
    %72 = vector.shape_cast %69 : vector<8x8xf32> to vector<1x1x8x8xf32>
    tpu.vector_store %arg15[%c0_37, %c2, %c0_38, %c0_39], %72 {strides = array<i32>} : memref<1x4x8x8xf32, #tpu.memory_space<vmem>>, vector<1x1x8x8xf32>,
    %cst_40 = arith.constant dense<0.000000e+00> : vector<8x8xf32>
    %73 = tpu.matmul %69, %57, %cst_40 {dimension_numbers = #tpu.dot_dimension_numbers<[1], [0], [0], [1], [0, 0, 1, 1], [], []>} : vector<8x8xf32>, vector<8x8xf32>, vector<8x8xf32> -> vector<8x8xf32>
    %c2_41 = arith.constant 2 : index
    %c0_42 = arith.constant 0 : index
    %c0_43 = arith.constant 0 : index
    %74 = vector.load %arg4[%c2_41, %c0_42, %c0_43] : memref<4x8x32xf32, #tpu.memory_space<vmem>>, vector<1x8x32xf32>
    %75 = vector.shape_cast %74 : vector<1x8x32xf32> to vector<8x32xf32>
    %cst_44 = arith.constant dense<0.000000e+00> : vector<8x32xf32>
    %76 = tpu.matmul %73, %75, %cst_44 {dimension_numbers = #tpu.dot_dimension_numbers<[1], [0], [0], [1], [0, 0, 1, 1], [], []>} : vector<8x8xf32>, vector<8x32xf32>, vector<8x32xf32> -> vector<8x32xf32>
    %77 = arith.addf %54, %76 : vector<8x32xf32>
    %78 = vector.extract_strided_slice %6 {offsets = [0, 24], sizes = [8, 8], strides = [1, 1]} : vector<8x96xf32> to vector<8x8xf32>
    %79 = vector.extract_strided_slice %6 {offsets = [0, 56], sizes = [8, 8], strides = [1, 1]} : vector<8x96xf32> to vector<8x8xf32>
    %80 = vector.extract_strided_slice %6 {offsets = [0, 88], sizes = [8, 8], strides = [1, 1]} : vector<8x96xf32> to vector<8x8xf32>
    %cst_45 = arith.constant dense<0.000000e+00> : vector<8x8xf32>
    %81 = tpu.matmul %78, %79, %cst_45 {dimension_numbers = #tpu.dot_dimension_numbers<[1], [1], [0], [0], [0, 0, 1, 0], [], []>} : vector<8x8xf32>, vector<8x8xf32>, vector<8x8xf32> -> vector<8x8xf32>
    %cst_46 = arith.constant 0.353553385 : f32
    %82 = vector.broadcast %cst_46 : f32 to vector<8x8xf32>
    %83 = arith.mulf %81, %82 : vector<8x8xf32>
    %cst_47 = arith.constant dense<0xFF800000> : vector<8xf32>
    %84 = vector.multi_reduction <maximumf>, %83, %cst_47 [1] : vector<8x8xf32> to vector<8xf32>
    %85 = vector.shape_cast %84 : vector<8xf32> to vector<8x1xf32>
    %86 = vector.broadcast %85 : vector<8x1xf32> to vector<8x8xf32>
    %87 = arith.subf %83, %86 : vector<8x8xf32>
    %88 = math.exp %87 : vector<8x8xf32>
    %cst_48 = arith.constant dense<0.000000e+00> : vector<8xf32>
    %89 = vector.multi_reduction <add>, %88, %cst_48 [1] : vector<8x8xf32> to vector<8xf32>
    %90 = vector.shape_cast %89 : vector<8xf32> to vector<8x1xf32>
    %91 = vector.broadcast %90 : vector<8x1xf32> to vector<8x8xf32>
    %92 = arith.divf %88, %91 : vector<8x8xf32>
    %c0_49 = arith.constant 0 : index
    %c3 = arith.constant 3 : index
    %c0_50 = arith.constant 0 : index
    %c0_51 = arith.constant 0 : index
    %93 = vector.load %arg15[%c0_49, %c3, %c0_50, %c0_51] : memref<1x4x8x8xf32, #tpu.memory_space<vmem>>, vector<1x1x8x8xf32>
    %94 = vector.shape_cast %93 : vector<1x1x8x8xf32> to vector<8x8xf32>
    %95 = vector.shape_cast %92 : vector<8x8xf32> to vector<1x1x8x8xf32>
    tpu.vector_store %arg15[%c0_49, %c3, %c0_50, %c0_51], %95 {strides = array<i32>} : memref<1x4x8x8xf32, #tpu.memory_space<vmem>>, vector<1x1x8x8xf32>,
    %cst_52 = arith.constant dense<0.000000e+00> : vector<8x8xf32>
    %96 = tpu.matmul %92, %80, %cst_52 {dimension_numbers = #tpu.dot_dimension_numbers<[1], [0], [0], [1], [0, 0, 1, 1], [], []>} : vector<8x8xf32>, vector<8x8xf32>, vector<8x8xf32> -> vector<8x8xf32>
    %c3_53 = arith.constant 3 : index
    %c0_54 = arith.constant 0 : index
    %c0_55 = arith.constant 0 : index
    %97 = vector.load %arg4[%c3_53, %c0_54, %c0_55] : memref<4x8x32xf32, #tpu.memory_space<vmem>>, vector<1x8x32xf32>
    %98 = vector.shape_cast %97 : vector<1x8x32xf32> to vector<8x32xf32>
    %cst_56 = arith.constant dense<0.000000e+00> : vector<8x32xf32>
    %99 = tpu.matmul %96, %98, %cst_56 {dimension_numbers = #tpu.dot_dimension_numbers<[1], [0], [0], [1], [0, 0, 1, 1], [], []>} : vector<8x8xf32>, vector<8x32xf32>, vector<8x32xf32> -> vector<8x32xf32>
    %100 = arith.addf %77, %99 : vector<8x32xf32>
    %101 = arith.addf %1, %100 : vector<8x32xf32>
    %cst_57 = arith.constant dense<0.000000e+00> : vector<8xf32>
    %102 = vector.multi_reduction <add>, %101, %cst_57 [1] : vector<8x32xf32> to vector<8xf32>
    %103 = vector.shape_cast %102 : vector<8xf32> to vector<8x1xf32>
    %cst_58 = arith.constant 3.200000e+01 : f32
    %104 = vector.broadcast %cst_58 : f32 to vector<8x1xf32>
    %105 = arith.divf %103, %104 : vector<8x1xf32>
    %106 = vector.broadcast %105 : vector<8x1xf32> to vector<8x32xf32>
    %107 = arith.subf %101, %106 : vector<8x32xf32>
    %108 = arith.mulf %107, %107 : vector<8x32xf32>
    %cst_59 = arith.constant dense<0.000000e+00> : vector<8xf32>
    %109 = vector.multi_reduction <add>, %108, %cst_59 [1] : vector<8x32xf32> to vector<8xf32>
    %110 = vector.shape_cast %109 : vector<8xf32> to vector<8x1xf32>
    %cst_60 = arith.constant 3.200000e+01 : f32
    %111 = vector.broadcast %cst_60 : f32 to vector<8x1xf32>
    %112 = arith.divf %110, %111 : vector<8x1xf32>
    %113 = vector.broadcast %105 : vector<8x1xf32> to vector<8x32xf32>
    %114 = arith.subf %101, %113 : vector<8x32xf32>
    %cst_61 = arith.constant 9.99999974E-6 : f32
    %115 = vector.broadcast %cst_61 : f32 to vector<8x1xf32>
    %116 = arith.addf %112, %115 : vector<8x1xf32>
    %117 = math.rsqrt %116 : vector<8x1xf32>
    %118 = vector.broadcast %117 : vector<8x1xf32> to vector<8x32xf32>
    %119 = arith.mulf %114, %118 : vector<8x32xf32>
    %c0_62 = arith.constant 0 : index
    %c0_63 = arith.constant 0 : index
    %120 = vector.load %arg6[%c0_62, %c0_63] : memref<1x32xf32, #tpu.memory_space<vmem>>, vector<1x32xf32>
    %121 = vector.broadcast %120 : vector<1x32xf32> to vector<8x32xf32>
    %122 = arith.mulf %119, %121 : vector<8x32xf32>
    %c0_64 = arith.constant 0 : index
    %c0_65 = arith.constant 0 : index
    %123 = vector.load %arg7[%c0_64, %c0_65] : memref<1x32xf32, #tpu.memory_space<vmem>>, vector<1x32xf32>
    %124 = vector.broadcast %123 : vector<1x32xf32> to vector<8x32xf32>
    %125 = arith.addf %122, %124 : vector<8x32xf32>
    %c0_66 = arith.constant 0 : index
    %c0_67 = arith.constant 0 : index
    %126 = vector.load %arg8[%c0_66, %c0_67] : memref<32x64xf32, #tpu.memory_space<vmem>>, vector<32x64xf32>
    %cst_68 = arith.constant dense<0.000000e+00> : vector<8x64xf32>
    %127 = tpu.matmul %125, %126, %cst_68 {dimension_numbers = #tpu.dot_dimension_numbers<[1], [0], [0], [1], [0, 0, 1, 1], [], []>} : vector<8x32xf32>, vector<32x64xf32>, vector<8x64xf32> -> vector<8x64xf32>
    %c0_69 = arith.constant 0 : index
    %c0_70 = arith.constant 0 : index
    %128 = vector.load %arg9[%c0_69, %c0_70] : memref<1x64xf32, #tpu.memory_space<vmem>>, vector<1x64xf32>
    %129 = vector.broadcast %128 : vector<1x64xf32> to vector<8x64xf32>
    %130 = arith.addf %127, %129 : vector<8x64xf32>
    %cst_71 = arith.constant 0.000000e+00 : f32
    %131 = vector.broadcast %cst_71 : f32 to vector<8x64xf32>
    %132 = arith.maximumf %130, %131 : vector<8x64xf32>
    %c0_72 = arith.constant 0 : index
    %c0_73 = arith.constant 0 : index
    %133 = vector.load %arg10[%c0_72, %c0_73] : memref<64x32xf32, #tpu.memory_space<vmem>>, vector<64x32xf32>
    %cst_74 = arith.constant dense<0.000000e+00> : vector<8x32xf32>
    %134 = tpu.matmul %132, %133, %cst_74 {dimension_numbers = #tpu.dot_dimension_numbers<[1], [0], [0], [1], [0, 0, 1, 1], [], []>} : vector<8x64xf32>, vector<64x32xf32>, vector<8x32xf32> -> vector<8x32xf32>
    %c0_75 = arith.constant 0 : index
    %c0_76 = arith.constant 0 : index
    %135 = vector.load %arg11[%c0_75, %c0_76] : memref<1x32xf32, #tpu.memory_space<vmem>>, vector<1x32xf32>
    %136 = vector.broadcast %135 : vector<1x32xf32> to vector<8x32xf32>
    %137 = arith.addf %134, %136 : vector<8x32xf32>
    %138 = arith.addf %125, %137 : vector<8x32xf32>
    %cst_77 = arith.constant dense<0.000000e+00> : vector<8xf32>
    %139 = vector.multi_reduction <add>, %138, %cst_77 [1] : vector<8x32xf32> to vector<8xf32>
    %140 = vector.shape_cast %139 : vector<8xf32> to vector<8x1xf32>
    %cst_78 = arith.constant 3.200000e+01 : f32
    %141 = vector.broadcast %cst_78 : f32 to vector<8x1xf32>
    %142 = arith.divf %140, %141 : vector<8x1xf32>
    %143 = vector.broadcast %142 : vector<8x1xf32> to vector<8x32xf32>
    %144 = arith.subf %138, %143 : vector<8x32xf32>
    %145 = arith.mulf %144, %144 : vector<8x32xf32>
    %cst_79 = arith.constant dense<0.000000e+00> : vector<8xf32>
    %146 = vector.multi_reduction <add>, %145, %cst_79 [1] : vector<8x32xf32> to vector<8xf32>
    %147 = vector.shape_cast %146 : vector<8xf32> to vector<8x1xf32>
    %cst_80 = arith.constant 3.200000e+01 : f32
    %148 = vector.broadcast %cst_80 : f32 to vector<8x1xf32>
    %149 = arith.divf %147, %148 : vector<8x1xf32>
    %150 = vector.broadcast %142 : vector<8x1xf32> to vector<8x32xf32>
    %151 = arith.subf %138, %150 : vector<8x32xf32>
    %cst_81 = arith.constant 9.99999974E-6 : f32
    %152 = vector.broadcast %cst_81 : f32 to vector<8x1xf32>
    %153 = arith.addf %149, %152 : vector<8x1xf32>
    %154 = math.rsqrt %153 : vector<8x1xf32>
    %155 = vector.broadcast %154 : vector<8x1xf32> to vector<8x32xf32>
    %156 = arith.mulf %151, %155 : vector<8x32xf32>
    %c0_82 = arith.constant 0 : index
    %c0_83 = arith.constant 0 : index
    %157 = vector.load %arg12[%c0_82, %c0_83] : memref<1x32xf32, #tpu.memory_space<vmem>>, vector<1x32xf32>
    %158 = vector.broadcast %157 : vector<1x32xf32> to vector<8x32xf32>
    %159 = arith.mulf %156, %158 : vector<8x32xf32>
    %c0_84 = arith.constant 0 : index
    %c0_85 = arith.constant 0 : index
    %160 = vector.load %arg13[%c0_84, %c0_85] : memref<1x32xf32, #tpu.memory_space<vmem>>, vector<1x32xf32>
    %161 = vector.broadcast %160 : vector<1x32xf32> to vector<8x32xf32>
    %162 = arith.addf %159, %161 : vector<8x32xf32>
    %c0_86 = arith.constant 0 : index
    %c0_87 = arith.constant 0 : index
    %c0_88 = arith.constant 0 : index
    %163 = vector.load %arg14[%c0_86, %c0_87, %c0_88] : memref<1x8x32xf32, #tpu.memory_space<vmem>>, vector<1x8x32xf32>
    %164 = vector.shape_cast %163 : vector<1x8x32xf32> to vector<8x32xf32>
    %165 = vector.shape_cast %162 : vector<8x32xf32> to vector<1x8x32xf32>
    tpu.vector_store %arg14[%c0_86, %c0_87, %c0_88], %165 {strides = array<i32>} : memref<1x8x32xf32, #tpu.memory_space<vmem>>, vector<1x8x32xf32>,
    return
  }
  func.func @transform_0(%arg0: i32) -> (i32, i32, i32) {
    %c0_i32 = arith.constant 0 : i32
    %c0_i32_0 = arith.constant 0 : i32
    %c0_i32_1 = arith.constant 0 : i32
    return %arg0, %c0_i32, %c0_i32_0 : i32, i32, i32
  }
  func.func @transform_1(%arg0: i32) -> (i32, i32) {
    %c0_i32 = arith.constant 0 : i32
    %c0_i32_0 = arith.constant 0 : i32
    %c0_i32_1 = arith.constant 0 : i32
    return %c0_i32, %c0_i32_0 : i32, i32
  }
  func.func @transform_2(%arg0: i32) -> (i32, i32) {
    %c0_i32 = arith.constant 0 : i32
    %c0_i32_0 = arith.constant 0 : i32
    %c0_i32_1 = arith.constant 0 : i32
    return %c0_i32, %c0_i32_0 : i32, i32
  }
  func.func @transform_3(%arg0: i32) -> (i32, i32, i32) {
    %c0_i32 = arith.constant 0 : i32
    %c0_i32_0 = arith.constant 0 : i32
    %c0_i32_1 = arith.constant 0 : i32
    %c0_i32_2 = arith.constant 0 : i32
    return %c0_i32, %c0_i32_0, %c0_i32_1 : i32, i32, i32
  }
  func.func @transform_4(%arg0: i32) -> (i32, i32) {
    %c0_i32 = arith.constant 0 : i32
    %c0_i32_0 = arith.constant 0 : i32
    %c0_i32_1 = arith.constant 0 : i32
    return %c0_i32, %c0_i32_0 : i32, i32
  }
  func.func @transform_5(%arg0: i32) -> (i32, i32) {
    %c0_i32 = arith.constant 0 : i32
    %c0_i32_0 = arith.constant 0 : i32
    %c0_i32_1 = arith.constant 0 : i32
    return %c0_i32, %c0_i32_0 : i32, i32
  }
  func.func @transform_6(%arg0: i32) -> (i32, i32) {
    %c0_i32 = arith.constant 0 : i32
    %c0_i32_0 = arith.constant 0 : i32
    %c0_i32_1 = arith.constant 0 : i32
    return %c0_i32, %c0_i32_0 : i32, i32
  }
  func.func @transform_7(%arg0: i32) -> (i32, i32) {
    %c0_i32 = arith.constant 0 : i32
    %c0_i32_0 = arith.constant 0 : i32
    %c0_i32_1 = arith.constant 0 : i32
    return %c0_i32, %c0_i32_0 : i32, i32
  }
  func.func @transform_8(%arg0: i32) -> (i32, i32) {
    %c0_i32 = arith.constant 0 : i32
    %c0_i32_0 = arith.constant 0 : i32
    %c0_i32_1 = arith.constant 0 : i32
    return %c0_i32, %c0_i32_0 : i32, i32
  }
  func.func @transform_9(%arg0: i32) -> (i32, i32) {
    %c0_i32 = arith.constant 0 : i32
    %c0_i32_0 = arith.constant 0 : i32
    %c0_i32_1 = arith.constant 0 : i32
    return %c0_i32, %c0_i32_0 : i32, i32
  }
  func.func @transform_10(%arg0: i32) -> (i32, i32) {
    %c0_i32 = arith.constant 0 : i32
    %c0_i32_0 = arith.constant 0 : i32
    %c0_i32_1 = arith.constant 0 : i32
    return %c0_i32, %c0_i32_0 : i32, i32
  }
  func.func @transform_11(%arg0: i32) -> (i32, i32) {
    %c0_i32 = arith.constant 0 : i32
    %c0_i32_0 = arith.constant 0 : i32
    %c0_i32_1 = arith.constant 0 : i32
    return %c0_i32, %c0_i32_0 : i32, i32
  }
  func.func @transform_12(%arg0: i32) -> (i32, i32) {
    %c0_i32 = arith.constant 0 : i32
    %c0_i32_0 = arith.constant 0 : i32
    %c0_i32_1 = arith.constant 0 : i32
    return %c0_i32, %c0_i32_0 : i32, i32
  }
  func.func @transform_13(%arg0: i32) -> (i32, i32, i32) {
    %c0_i32 = arith.constant 0 : i32
    %c0_i32_0 = arith.constant 0 : i32
    %c0_i32_1 = arith.constant 0 : i32
    return %arg0, %c0_i32, %c0_i32_0 : i32, i32, i32
  }
  func.func @transform_14(%arg0: i32) -> (i32, i32, i32, i32) {
    %c0_i32 = arith.constant 0 : i32
    %c0_i32_0 = arith.constant 0 : i32
    %c0_i32_1 = arith.constant 0 : i32
    %c0_i32_2 = arith.constant 0 : i32
    return %arg0, %c0_i32, %c0_i32_0, %c0_i32_1 : i32, i32, i32, i32
  }
}

</mosaic_0001>

<bundles_post_ra>
// kernel: tpu_custom_call.1
= control target key start
LH: loop header
LB: loop body
LE: loop exit
PB: predicated region body
PF: predicated region fallthrough
CT: control target
= control target key end

     0   :  { %s1898_s0 = inlined_call_operand.hbm [shape: f32[2,8,32], index: 0, kind: input, shape index: {}]   ;;  %s1899_s1 = inlined_call_operand.vmem [shape: f32[32,96], index: 1, kind: input, shape index: {}]   ;;  %s1900_s2 = inlined_call_operand.vmem [shape: f32[1,96], index: 2, kind: input, shape index: {}]   ;;  %s1901_s3 = inlined_call_operand.vmem [shape: f32[4,8,32], index: 3, kind: input, shape index: {}]   ;;  %s1902_s4 = inlined_call_operand.vmem [shape: f32[1,32], index: 4, kind: input, shape index: {}]   ;;  %s1903_s5 = inlined_call_operand.vmem [shape: f32[1,32], index: 5, kind: input, shape index: {}]   ;;  %s1904_s6 = inlined_call_operand.vmem [shape: f32[1,32], index: 6, kind: input, shape index: {}]   ;;  %s1905_s7 = inlined_call_operand.vmem [shape: f32[32,64], index: 7, kind: input, shape index: {}]   ;;  %s1906_s8 = inlined_call_operand.vmem [shape: f32[1,64], index: 8, kind: input, shape index: {}]   ;;  %s1907_s9 = inlined_call_operand.vmem [shape: f32[64,32], index: 9, kind: input, shape index: {}]   ;;  %s1908_s10 = inlined_call_operand.vmem [shape: f32[1,32], index: 10, kind: input, shape index: {}]   ;;  %s1909_s11 = inlined_call_operand.vmem [shape: f32[1,32], index: 11, kind: input, shape index: {}]   ;;  %s1910_s12 = inlined_call_operand.vmem [shape: f32[1,32], index: 12, kind: input, shape index: {}]   ;;  %s1911_s13 = inlined_call_operand.hbm [shape: f32[2,8,32], index: 13, kind: output, shape index: {0}]   ;;  %s1912_s14 = inlined_call_operand.hbm [shape: f32[2,4,8,8], index: 14, kind: output, shape index: {1}]  }
   0x1   :  { %1920 = sst [smem:[#allocation16_spill]] %s1909_s11 }
   0x2   :  { %1921 = sst [smem:[#allocation17_spill]] %s1910_s12 }
   0x3   :  { %1922 = sst [smem:[#allocation18_spill]] %s1911_s13 }
   0x4   :  { %20 = vsyncpa [#allocation3], 0 }
   0x5   :  { %22 = vsyncpa [#allocation3 + $0x1], 0 }
   0x6   :  { %23 = vsyncpa [#allocation4], 0 }
   0x7   :  { %25 = vsyncpa [#allocation4 + $0x1], 0 }
   0x8   :  { %26 = vsyncpa [#allocation7], 0 }
   0x9   :  { %28 = vsyncpa [#allocation7 + $0x1], 0  ;;  %s1598_s29 = smov 0   ;;  %s1600_s30 = smov 0  }
   0xa   :  { %s1602_s15 = smov 0   ;;  %s1604_s16 = smov 0  }
   0xb LB: > { %1923 = sst [smem:[#allocation11_spill]] %s1495_s29  ;;  %s1619_s17 = sadd.s32 4294967295, %s1507_s16   ;;  %s1507_s16 = sphi %s1604_s16, %s1940_s16   ;;  %s1503_s15 = sphi %s1602_s15, %s1942_s15   ;;  %s1499_s30 = sphi %s1600_s30, %s1944_s30   ;;  %s1495_s29 = sphi %s1598_s29, %s1943_s29  }
   0xc   : > { %1924 = sst [smem:[#allocation12_spill]] %s1503_s15  ;;  %s1242_s18 = sadd.s32 4294967294, %s1507_s16  }
   0xd   : > { %s1623_s19 = sadd.s32 1, %s1507_s16   ;;  %s41_s20 = sadd.s32 1, %s1503_s15 }
   0xe   : > { %1925 = sst [smem:[#allocation13_spill]] %s1623_s19  ;;  %s38_s21 = ssub.s32 %s1507_s16, %s1623_s19 }
   0xf   : > { %p48_p0 = scmp.ne.s32.totalorder %s1503_s15, %s1499_s30  ;;  %p39_p1 = scmp.eq.s32.totalorder %s38_s21, 0 }
  0x10   : > { %p49_p2 = scmp.eq.s32.totalorder %s1507_s16, 0  ;;  %p54_p3 = scmp.ne.s32.totalorder %s1499_s30, %s1495_s29 }
  0x11   : > { %p55_p4 = scmp.eq.s32.totalorder %s1619_s17, 0  ;;  %p330_p7 = scmp.eq.s32.totalorder %s1619_s17, 1 }
  0x12   : > { %s1635_s22 = scalar_select %p39_p1, %s1503_s15, %s41_s20  }
  0x13   : > { %p1637_p5 = por %p49_p2, %p48_p0  ;;  %p1641_p6 = por %p55_p4, %p54_p3 }
  0x14   : > { %1926 = sst [smem:[#allocation14_spill]] %s1635_s22  ;;  %p336_p8 = scmp.eq.s32.totalorder %s1242_s18, 1 }
  0x15   : > { %p1301_p10 = scmp.lt.s32.totalorder %s1507_s16, 2  ;;  %p1648_p11 = por %p330_p7, %p48_p0 }
  0x16   : > { %p1652_p12 = por %p336_p8, %p54_p3  ;;  %s418_s27 = sand.u32 1, %s1503_s15  }
  0x17   : > { %s1246_s28 = sshll.u32 %s1507_s16, 3  ;;  %s1245_s20 = sshll.u32 %s418_s27, 3 }
  0x18   : > { %s1930_s26 = scalar_select %p1652_p12, 1, 0 }
  0x19   : > { %s426_s19 = scalar_lea.hbm %s1898_s0, %s1246_s28  ;;  %s422_s18 = scalar_lea.vmem [#allocation2], %s1245_s20 }
  0x1a   : > { %1931 = sst [smem:[#allocation15_spill]] %s1930_s26  ;;  %s428_s29 = sshll.u32 %s426_s19, 4  ;;  %s429_s29 = int_to_ptr.hbm [resolvable:$true] %s428_s29 }
  0x1b   : > { %s430_s12 = sshll.u32 %s422_s18, 4  ;;  %p1663_p13 = pnand %p1301_p10, %p1637_p5  ;;  %s431_s12 = int_to_ptr.vmem [resolvable:$true] %s430_s12 }
  0x1c   : > { %p1247_p0 = scmp.ge.s32.totalorder %s1507_s16, 1  ;;  %p435_p1 = scmp.lt.s32.totalorder %s1507_s16, 3 }
  0x1d   : > { %s419_s15 = scalar_lea.sflag [#allocation3], %s418_s27  ;;  %s1379_s26 = sshra.s32 %s429_s29, 4  ;;  %s1380_s26 = int_to_ptr.hbm [resolvable:$true] %s1379_s26 }
  0x1e   : > { %s1381_s11 = scalar_lea.hbm %s1380_s26, 8  ;;  %p1383_p3 = pneg %p1663_p13 }
  0x1f   : > { %p1382_p2 = scmp.ne.s32.totalorder %s1380_s26, %s1381_s11  ;;  %s1386_s23 = scalar_lea.hbm %s1898_s0, 16 }
  0x20   : > { %p1387_p5 = scmp.lt.s32.totalorder %s1380_s26, %s1898_s0  ;;  %p1388_p8 = scmp.lt.s32.totalorder %s1386_s23, %s1381_s11 }
  0x21   : > { %p1384_p4 = pnand %p1383_p3, %p1382_p2 }
  0x22   : > { %p1389_p10 = por %p1388_p8, %p1387_p5 }
  0x23   : > { %p1385_p7 = pneg %p1384_p4 }
  0x25   : > { %p1390_p9 = pnand %p1389_p10, %p1385_p7 }
  0x27   : > { %1393 = shalt.err (!%p1390_p9)
}
  0x28   : > { %1293 = dma.hbm_to_vmem [thread:$0]  (!%p1663_p13), %s429_s29, 128, %s431_s12, %s419_s15  }
  0x29   : > { %p436_p2 = pnand %p1247_p0, %p435_p1 }
  0x2a   : > { %s1684_s27 = sand.u32 (!%p436_p2), 1, %s1499_s30  }
  0x2b   : > { %439 = sbr.rel (%p436_p2) target bundleno = 2706 (0xa92), region = 72  ;;  %s1919_s11 = sshll.u32 (!%p436_p2), %s1684_s27, 3 }
  0x2c   : > { %s442_s26 = scalar_lea.sflag (!%p436_p2), [#allocation3], %s1684_s27  ;;  %s445_s21 = scalar_lea.vmem (!%p436_p2), [#allocation2], %s1919_s11 }
  0x30   : > { %1482 = dma.done.wait (%p1641_p6), %s442_s26, 128  }
  0x31   : > { %1484 = vsyncadd (%p1641_p6), %s442_s26, 4294967168  ;;  %v500_v0 = vld [vmem:[%s1899_s1 + $0x18] sm:$0xff]  ;;  %v499_v1 = vld [vmem:[%s1899_s1 + $0x10] sm:$0xff]  ;;  %vm505_vm0 = vcmask 261120   ;;  %s1509_s20 = smov 88   ;;  %s1510_s26 = smov 96  }
  0x32   : > { %521 = vmatpush.msra.mxu0 %v500_v0  ;;  %v498_v2 = vld [vmem:[%s1899_s1 + $0x8] sm:$0xff]  ;;  %v497_v3 = vld [vmem:[%s1899_s1] sm:$0xff]  ;;  %vm533_vm1 = vcmask 64512   ;;  %s1512_s12 = smov 56   ;;  %s1513_s13 = smov 112  }
  0x33   : > { %v1706_v4 = vld [vmem:[%s445_s21] sm:$0xff]  ;;  %s1511_s21 = smov 120   ;;  %s1514_s29 = smov 104  }
  0x34   : > { %522 = vmatpush.msra.mxu0 %v499_v1  ;;  %v1349_v5 = vld [vmem:[%s1900_s2] ss:$0 sm:$0xff]  ;;  %s1515_s19 = smov 64   ;;  %s1250_s22 = sshll.u32 %s1684_s27, 5  ;;  %v1260_v45 = vld [vmem:[%s1901_s3 + $0x8] sm:$0xff] }
  0x35   : > { %v610_v12 = vld [vmem:[%s1901_s3] sm:$0xff]  ;;  %s1731_s23 = scalar_lea.vmem [#allocation6], %s1250_s22  ;;  %s1516_s24 = smov 80   ;;  %739 = vmatpush.msra.mxu1 %v1260_v45 }
  0x36   : > { %523 = vmatpush.msra.mxu0 %v498_v2  ;;  %629 = vmatpush.msra.mxu3 %v610_v12  ;;  %s1517_s28 = smov 72   ;;  %s1283_s15 = sshll.u32 %s1619_s17, 5 }
  0x37   : > { %s1133_s18 = sshll.u32 %s1731_s23, 4  ;;  %s1134_s18 = int_to_ptr.vmem [resolvable:$true] %s1133_s18 }
  0x38   : > { %524 = vmatpush.msra.mxu0 %v497_v3 }
  0x39   : > { %1251 = vmatmul.msk.f32.vlgmr.msra.gmra.mxu0 %vm505_vm0, %v1706_v4 }
  0xb6   : > { %v526_v6 = vpop.f32.mrf.mxu0 }
  0xb7   : > { %v1713_v7 = vadd.f32 %v1349_v5, %v526_v6 }
  0xb9   : > { %640 = vrot.lane.b32.xlu2 %v1713_v7, %s1509_s20  ;;  %531 = vrot.lane.b32.xlu0 %v1713_v7, %s1510_s26  ;;  %s1107_s20 = scalar_lea.sflag [#allocation7], %s1684_s27 }
  0xc1   : > { %638 = vrot.lane.b32.xlu2 %v1713_v7, %s1511_s21  ;;  %s1518_s21 = smov 48  }
 0x113   : > { %v641_v31 = vpop.permute.xlu2 %640 }
 0x11b   : > { %v639_v33 = vpop.permute.xlu2 %638 }
 0x12b   : > { %v532_v8 = vpop.permute.xlu0 %531 }
 0x12c   : > { %1252 = vmatpush.xpose.msk.msrb.mxu0 %vm533_vm1, %v532_v8 }
 0x12f   : > { %1253 = vmatmul.msk.f32.vlgmr.msrb.gmra.mxu0 %vm533_vm1, %v1713_v7 }
 0x1ac   : > { %v555_v9 = vpop.f32.mrf.mxu0 }
 0x1ad   : > { %v558_v10 = vmul.f32 0.35355338, %v555_v9 }
 0x1af   : > { %v559_v11 = vsel %vm533_vm1, %v558_v10, -inf }
 0x1b0   : > { %560 = vmax.xlane.f32.xlu0 %v559_v11 }
 0x1c4   : > { %693 = vrot.lane.b32.xlu0 %v1713_v7, %s1512_s12  ;;  %s1519_s12 = smov 40  }
 0x1cc   : > { %745 = vrot.lane.b32.xlu0 %v1713_v7, %s1513_s13 }
 0x1d4   : > { %852 = vrot.lane.b32.xlu0 %v1713_v7, %s1514_s29  ;;  %s1429_s29 = scalar_lea.hbm %s1912_s14, 64 }
 0x223   : > { %v561_v13 = vpop.xlane.xlu0 %560 }
 0x224   : > { %v562_v14 = vsub.f32 %v558_v10, %v561_v13 }
 0x226   : > { %v563_v15 = vmul.f32 1.442695, %v562_v14 }
 0x228   : > { %1357 = vpow2.f32 %v563_v15 }
 0x22e   : > { %v1358_v16 = vpop.eup %1357 }
 0x22f   : > { %v565_v17 = vsel %vm533_vm1, %v1358_v16, 0.0 }
 0x230   : > { %566 = vadd.xlane.f32.xlu1 %v565_v17 }
 0x236   : > { %v694_v18 = vpop.permute.xlu0 %693 }
 0x237   : > { %714 = vmatpush.msrb.mxu3 %v694_v18 }
 0x23e   : > { %v746_v43 = vpop.permute.xlu0 %745 }
 0x246   : > { %v853_v6 = vpop.permute.xlu0 %852 }
 0x249   : > { %584 = vrot.lane.b32.xlu1 %v1713_v7, %s1515_s19 }
 0x2a3   : > { %v567_v19 = vpop.xlane.xlu1 %566 }
 0x2a4   : > { %1359 = vrcp.f32 %v567_v19  ;;  %v579_v23 = vand.u32 2147483648, %v567_v19  ;;  %v577_v25 = vand.u32 2147483647, %v567_v19  ;;  %vm573_vm3 = vweird.f32 %v567_v19 }
 0x2a6   : > { %v580_v27 = vor.u32 1.1754944e-38, %v579_v23  ;;  %vm578_vm5 = vcmp.eq.f32.partialorder %v577_v25, 8.507059e+37 }
 0x2aa   : > { %v1360_v20 = vpop.eup %1359 }
 0x2ab   : > { %v569_v21 = vmul.f32 %v1360_v20, %v567_v19  ;;  %vm574_vm2 = vweird.f32 %v1360_v20 }
 0x2ac   : > { %vm575_vm4 = vmor %vm573_vm3, %vm574_vm2 }
 0x2ad   : > { %v570_v22 = vsub.f32 1.0, %v569_v21 }
 0x2af   : > { %v571_v24 = vmul.f32 %v1360_v20, %v570_v22 }
 0x2b1   : > { %v572_v26 = vadd.f32 %v1360_v20, %v571_v24 }
 0x2b3   : > { %v576_v28 = vsel %vm575_vm4, %v1360_v20, %v572_v26 }
 0x2b4   : > { %v581_v29 = vsel %vm578_vm5, %v580_v27, %v576_v28 }
 0x2b5   : > { %v582_v30 = vmul.f32 %v1358_v16, %v581_v29 }
 0x2b7   : > { %583 = vst.msk [vmem:[%s1731_s23] sm:$0xff] %vm533_vm1, %v582_v30 }
 0x2bb   : > { %v585_v32 = vpop.permute.xlu1 %584 }
 0x2bc   : > { %605 = vmatpush.msra.mxu2 %v585_v32 }
 0x2bd   : > { %1254 = vmatmul.msk.f32.vlgmr.msra.gmra.mxu2 %vm533_vm1, %v582_v30  ;;  %v1266_v30 = vld [vmem:[%s1901_s3 + $0x10] sm:$0xff] }
 0x2be   : > { %1256 = vmatpush.xpose.msk.msrb.mxu2 %vm533_vm1, %v641_v31  ;;  %v1272_v31 = vld [vmem:[%s1901_s3 + $0x18] sm:$0xff] }
 0x2c5   : > { %1257 = vmatmul.msk.f32.vlgmr.msrb.gmra.mxu2 %vm533_vm1, %v639_v33 }
 0x340   : > { %v607_v34 = vpop.f32.mrf.mxu2 }
 0x341   : > { %1255 = vmatmul.msk.f32.vlgmr.msra.gmra.mxu3 %vm533_vm1, %v607_v34 }
 0x342   : > { %846 = vmatpush.msra.mxu3 %v1266_v30  ;;  %v1031_v30 = vld [vmem:[%s1907_s9] sm:$0xff] }
 0x348   : > { %v663_v35 = vpop.f32.mrf.mxu2 }
 0x349   : > { %v666_v36 = vmul.f32 0.35355338, %v663_v35 }
 0x34b   : > { %v667_v37 = vsel %vm533_vm1, %v666_v36, -inf }
 0x34c   : > { %668 = vmax.xlane.f32.xlu2 %v667_v37 }
 0x364   : > { %747 = vrot.lane.b32.xlu2 %v1713_v7, %s1516_s24  ;;  %s1132_s24 = scalar_lea.hbm %s1912_s14, %s1283_s15 }
 0x3bf   : > { %v669_v38 = vpop.xlane.xlu2 %668 }
 0x3c0   : > { %v670_v39 = vsub.f32 %v666_v36, %v669_v38 }
 0x3c2   : > { %v671_v40 = vmul.f32 1.442695, %v670_v39 }
 0x3c4   : > { %1361 = vpow2.f32 %v671_v40  ;;  %v1754_v3 = vpop.f32.mrf.mxu3 }
 0x3c7   : > { %v748_v41 = vpop.permute.xlu2 %747 }
 0x3c8   : > { %1262 = vmatpush.xpose.msk.msra.mxu0 %vm533_vm1, %v748_v41 }
 0x3ca   : > { %v1362_v42 = vpop.eup %1361 }
 0x3cb   : > { %1263 = vmatmul.msk.f32.vlgmr.msra.gmra.mxu0 %vm533_vm1, %v746_v43  ;;  %v673_v44 = vsel %vm533_vm1, %v1362_v42, 0.0 }
 0x3cc   : > { %674 = vadd.xlane.f32.xlu1 %v673_v44 }
 0x3e5   : > { %854 = vrot.lane.b32.xlu1 %v1713_v7, %s1517_s28  ;;  %s1135_s28 = sshll.u32 %s1132_s24, 4  ;;  %s1136_s28 = int_to_ptr.hbm [resolvable:$true] %s1135_s28 }
 0x3e6   : > { %s1423_s26 = sshra.s32 %s1136_s28, 4  ;;  %s1424_s26 = int_to_ptr.hbm [resolvable:$true] %s1423_s26 }
 0x3e7   : > { %p1430_p0 = scmp.lt.s32.totalorder %s1424_s26, %s1912_s14 }
 0x43f   : > { %v675_v46 = vpop.xlane.xlu1 %674 }
 0x440   : > { %1363 = vrcp.f32 %v675_v46  ;;  %v687_v52 = vand.u32 2147483648, %v675_v46  ;;  %v685_v54 = vand.u32 2147483647, %v675_v46  ;;  %vm681_vm7 = vweird.f32 %v675_v46 }
 0x442   : > { %v688_v57 = vor.u32 1.1754944e-38, %v687_v52  ;;  %vm686_vm9 = vcmp.eq.f32.partialorder %v685_v54, 8.507059e+37 }
 0x446   : > { %v1364_v47 = vpop.eup %1363 }
 0x447   : > { %v677_v48 = vmul.f32 %v1364_v47, %v675_v46  ;;  %vm682_vm6 = vweird.f32 %v1364_v47  ;;  %v1350_v46 = vld [vmem:[%s1902_s4] ss:$0 sm:$0xff] }
 0x448   : > { %v770_v49 = vpop.f32.mrf.mxu0  ;;  %vm683_vm8 = vmor %vm681_vm7, %vm682_vm6  ;;  %vm1043_vm7 = vcmask 523264  }
 0x449   : > { %v678_v50 = vsub.f32 1.0, %v677_v48  ;;  %v773_v51 = vmul.f32 0.35355338, %v770_v49 }
 0x44b   : > { %v679_v53 = vmul.f32 %v1364_v47, %v678_v50  ;;  %v774_v55 = vsel %vm533_vm1, %v773_v51, -inf }
 0x44c   : > { %775 = vmax.xlane.f32.xlu2 %v774_v55  ;;  %v1520_v55 = vmov 32.0  }
 0x44d   : > { %v680_v56 = vadd.f32 %v1364_v47, %v679_v53 }
 0x44f   : > { %v684_v58 = vsel %vm683_vm8, %v1364_v47, %v680_v56  ;;  %v637_v47 = vadd.f32 %v1350_v46, %v1754_v3  ;;  %v1001_v3 = vld [vmem:[%s1905_s7 + $0x10] sm:$0xff] }
 0x450   : > { %v689_v59 = vsel %vm686_vm9, %v688_v57, %v684_v58 }
 0x451   : > { %v690_v60 = vmul.f32 %v1362_v42, %v689_v59 }
 0x453   : > { %1258 = vst.msk [vmem:[%s1731_s23 + $0x8] sm:$0xff] %vm533_vm1, %v690_v60  ;;  %1259 = vmatmul.msk.f32.vlgmr.msrb.gmra.mxu3 %vm533_vm1, %v690_v60 }
 0x457   : > { %v855_v61 = vpop.permute.xlu1 %854 }
 0x458   : > { %1268 = vmatpush.xpose.msk.msrb.mxu1 %vm533_vm1, %v855_v61 }
 0x4bf   : > { %v776_v62 = vpop.xlane.xlu2 %775 }
 0x4c0   : > { %v777_v63 = vsub.f32 %v773_v51, %v776_v62 }
 0x4c2   : > { %v778_v0 = vmul.f32 1.442695, %v777_v63 }
 0x4c4   : > { %1365 = vpow2.f32 %v778_v0 }
 0x4ca   : > { %v1366_v1 = vpop.eup %1365 }
 0x4cb   : > { %v780_v2 = vsel %vm533_vm1, %v1366_v1, 0.0 }
 0x4cc   : > { %781 = vadd.xlane.f32.xlu1 %v780_v2  ;;  %v1002_v2 = vld [vmem:[%s1905_s7 + $0x18] sm:$0xff] }
 0x4cd   : > { %1022 = vmatpush.msrb.mxu3 %v1002_v2 }
 0x4cf   : > { %1023 = vmatpush.msrb.mxu3 %v1001_v3 }
 0x4d6   : > { %v716_v5 = vpop.f32.mrf.mxu3 }
 0x4d7   : > { %1261 = vmatmul.msk.f32.vlgmr.msra.gmra.mxu1 %vm533_vm1, %v716_v5  ;;  %v1000_v5 = vld [vmem:[%s1905_s7 + $0x8] sm:$0xff] }
 0x4d8   : > { %1024 = vmatpush.msrb.mxu3 %v1000_v5 }
 0x4df   : > { %1269 = vmatmul.msk.f32.vlgmr.msrb.gmra.mxu1 %vm533_vm1, %v853_v6  ;;  %v999_v6 = vld [vmem:[%s1905_s7] sm:$0xff] }
 0x4e0   : > { %1025 = vmatpush.msrb.mxu3 %v999_v6 }
 0x53f   : > { %v782_v8 = vpop.xlane.xlu1 %781 }
 0x540   : > { %1367 = vrcp.f32 %v782_v8  ;;  %v794_v12 = vand.u32 2147483648, %v782_v8  ;;  %v792_v14 = vand.u32 2147483647, %v782_v8  ;;  %vm788_vm11 = vweird.f32 %v782_v8 }
 0x542   : > { %v795_v16 = vor.u32 1.1754944e-38, %v794_v12  ;;  %vm793_vm13 = vcmp.eq.f32.partialorder %v792_v14, 8.507059e+37 }
 0x546   : > { %v1368_v9 = vpop.eup %1367 }
 0x547   : > { %v784_v10 = vmul.f32 %v1368_v9, %v782_v8  ;;  %vm789_vm10 = vweird.f32 %v1368_v9  ;;  %v1038_v8 = vld [vmem:[%s1907_s9 + $0x38] sm:$0xff] }
 0x548   : > { %vm790_vm12 = vmor %vm788_vm11, %vm789_vm10  ;;  %1055 = vmatpush.msra.mxu1 %v1038_v8 }
 0x549   : > { %v785_v11 = vsub.f32 1.0, %v784_v10  ;;  %v1036_v10 = vld [vmem:[%s1907_s9 + $0x28] sm:$0xff] }
 0x54b   : > { %v786_v13 = vmul.f32 %v1368_v9, %v785_v11 }
 0x54d   : > { %v787_v15 = vadd.f32 %v1368_v9, %v786_v13  ;;  %v1035_v13 = vld [vmem:[%s1907_s9 + $0x20] sm:$0xff] }
 0x54f   : > { %v791_v17 = vsel %vm790_vm12, %v1368_v9, %v787_v15  ;;  %v1037_v9 = vld [vmem:[%s1907_s9 + $0x30] sm:$0xff]  ;;  %v1034_v15 = vld [vmem:[%s1907_s9 + $0x18] sm:$0xff] }
 0x550   : > { %v796_v18 = vsel %vm793_vm13, %v795_v16, %v791_v17  ;;  %1056 = vmatpush.msra.mxu1 %v1037_v9 }
 0x551   : > { %v797_v19 = vmul.f32 %v1366_v1, %v796_v18 }
 0x552   : > { %1057 = vmatpush.msra.mxu1 %v1036_v10 }
 0x553   : > { %1264 = vst.msk [vmem:[%s1731_s23 + $0x10] sm:$0xff] %vm533_vm1, %v797_v19 }
 0x554   : > { %v741_v20 = vpop.f32.mrf.mxu1  ;;  %1058 = vmatpush.msra.mxu1 %v1035_v13 }
 0x555   : > { %v744_v49 = vadd.f32 %v741_v20, %v637_v47 }
 0x556   : > { %1059 = vmatpush.msra.mxu1 %v1034_v15 }
 0x55c   : > { %v877_v21 = vpop.f32.mrf.mxu1 }
 0x55d   : > { %v880_v22 = vmul.f32 0.35355338, %v877_v21 }
 0x55f   : > { %v881_v23 = vsel %vm533_vm1, %v880_v22, -inf }
 0x560   : > { %882 = vmax.xlane.f32.xlu0 %v881_v23 }
 0x574   : > { %800 = vrot.lane.b32.xlu0 %v1713_v7, %s1518_s21  ;;  %s1425_s21 = scalar_lea.hbm %s1424_s26, 32 }
 0x575   : > { %p1426_p6 = scmp.ne.s32.totalorder %s1424_s26, %s1425_s21  ;;  %p1431_p1 = scmp.lt.s32.totalorder %s1429_s29, %s1425_s21 }
 0x577   : > { %p1427_p9 = pnand %p1426_p6, %p1648_p11  ;;  %p1432_p3 = por %p1431_p1, %p1430_p0 }
 0x579   : > { %p1428_p13 = pneg %p1427_p9 }
 0x57b   : > { %p1433_p4 = pnand %p1432_p3, %p1428_p13 }
 0x5d3   : > { %v883_v24 = vpop.xlane.xlu0 %882 }
 0x5d4   : > { %v884_v25 = vsub.f32 %v880_v22, %v883_v24  ;;  %v1351_v22 = vld [vmem:[%s1903_s5] ss:$0 sm:$0xff] }
 0x5d6   : > { %v885_v26 = vmul.f32 1.442695, %v884_v25  ;;  %v1352_v25 = vld [vmem:[%s1904_s6] ss:$0 sm:$0xff] }
 0x5d8   : > { %1369 = vpow2.f32 %v885_v26 }
 0x5de   : > { %v1370_v27 = vpop.eup %1369 }
 0x5df   : > { %v887_v28 = vsel %vm533_vm1, %v1370_v27, 0.0 }
 0x5e0   : > { %888 = vadd.xlane.f32.xlu2 %v887_v28  ;;  %v1033_v28 = vld [vmem:[%s1907_s9 + $0x10] sm:$0xff] }
 0x5e1   : > { %1060 = vmatpush.msra.mxu1 %v1033_v28 }
 0x5e6   : > { %v801_v29 = vpop.permute.xlu0 %800 }
 0x5e7   : > { %821 = vmatpush.msra.mxu2 %v801_v29  ;;  %v1032_v29 = vld [vmem:[%s1907_s9 + $0x8] sm:$0xff] }
 0x5e8   : > { %1265 = vmatmul.msk.f32.vlgmr.msra.gmra.mxu2 %vm533_vm1, %v797_v19  ;;  %1061 = vmatpush.msra.mxu1 %v1032_v29 }
 0x5e9   : > { %953 = vmatpush.msrb.mxu2 %v1272_v31  ;;  %v1353_v31 = vld [vmem:[%s1906_s8] ss:$0 sm:$0xff] }
 0x5ea   : > { %1062 = vmatpush.msra.mxu1 %v1031_v30 }
 0x5f8   : > { %907 = vrot.lane.b32.xlu2 %v1713_v7, %s1519_s12 }
 0x653   : > { %v889_v32 = vpop.xlane.xlu2 %888 }
 0x654   : > { %1371 = vrcp.f32 %v889_v32  ;;  %v901_v37 = vand.u32 2147483648, %v889_v32  ;;  %v899_v38 = vand.u32 2147483647, %v889_v32  ;;  %vm895_vm15 = vweird.f32 %v889_v32 }
 0x655   : > { %1373 = vrcp.f32 %v1520_v55 }
 0x656   : > { %v902_v40 = vor.u32 1.1754944e-38, %v901_v37  ;;  %vm900_vm3 = vcmp.eq.f32.partialorder %v899_v38, 8.507059e+37 }
 0x65a   : > { %v1372_v33 = vpop.eup %1371 }
 0x65b   : > { %v891_v34 = vmul.f32 %v1372_v33, %v889_v32  ;;  %v908_v35 = vpop.permute.xlu2 %907  ;;  %vm896_vm14 = vweird.f32 %v1372_v33  ;;  %v1374_v56 = vpop.eup %1373 }
 0x65c   : > { %928 = vmatpush.msrb.mxu0 %v908_v35  ;;  %vm897_vm2 = vmor %vm895_vm15, %vm896_vm14  ;;  %v964_v57 = vmul.f32 32.0, %v1374_v56  ;;  %v1354_v35 = vld [vmem:[%s1908_s10] ss:$0 sm:$0xff] }
 0x65d   : > { %v892_v36 = vsub.f32 1.0, %v891_v34 }
 0x65e   : > { %v965_v58 = vsub.f32 1.0, %v964_v57 }
 0x65f   : > { %v893_v7 = vmul.f32 %v1372_v33, %v892_v36 }
 0x660   : > { %v966_v59 = vmul.f32 %v1374_v56, %v965_v58 }
 0x661   : > { %v894_v39 = vadd.f32 %v1372_v33, %v893_v7 }
 0x662   : > { %v967_v60 = vadd.f32 %v1374_v56, %v966_v59 }
 0x663   : > { %v898_v41 = vsel %vm897_vm2, %v1372_v33, %v894_v39 }
 0x664   : > { %v903_v42 = vsel %vm900_vm3, %v902_v40, %v898_v41 }
 0x665   : > { %v904_v43 = vmul.f32 %v1370_v27, %v903_v42 }
 0x667   : > { %1270 = vst.msk [vmem:[%s1731_s23 + $0x18] sm:$0xff] %vm533_vm1, %v904_v43  ;;  %1271 = vmatmul.msk.f32.vlgmr.msrb.gmra.mxu0 %vm533_vm1, %v904_v43 }
 0x66b   : > { %v823_v44 = vpop.f32.mrf.mxu2 }
 0x66c   : > { %1267 = vmatmul.msk.f32.vlgmr.msra.gmra.mxu3 %vm533_vm1, %v823_v44 }
 0x6e4   : > { %v930_v45 = vpop.f32.mrf.mxu0 }
 0x6e5   : > { %1273 = vmatmul.msk.f32.vlgmr.msrb.gmra.mxu2 %vm533_vm1, %v930_v45  ;;  %vm968_vm1 = vweird.f32 %v1374_v56 }
 0x6e6   : > { %v1782_v61 = vsel %vm968_vm1, %v1374_v56, %v967_v60 }
 0x6ef   : > { %v848_v48 = vpop.f32.mrf.mxu3 }
 0x6f0   : > { %v851_v50 = vadd.f32 %v848_v48, %v744_v49 }
 0x768   : > { %v955_v51 = vpop.f32.mrf.mxu2 }
 0x769   : > { %v958_v52 = vadd.f32 %v955_v51, %v851_v50 }
 0x76b   : > { %v959_v53 = vadd.f32 %v958_v52, %v1706_v4 }
 0x76d   : > { %v960_v54 = vsel %vm505_vm0, %v959_v53, 0.0 }
 0x76e   : > { %961 = vadd.xlane.f32.xlu1 %v960_v54 }
 0x7e1   : > { %v962_v62 = vpop.xlane.xlu1 %961 }
 0x7e2   : > { %v970_v63 = vmul.f32 %v1782_v61, %v962_v62 }
 0x7e4   : > { %v971_v0 = vsub.f32 %v959_v53, %v970_v63 }
 0x7e6   : > { %v972_v1 = vmul.f32 %v971_v0, %v971_v0 }
 0x7e8   : > { %v973_v4 = vsel %vm505_vm0, %v972_v1, 0.0 }
 0x7e9   : > { %974 = vadd.xlane.f32.xlu0 %v973_v4 }
 0x85c   : > { %v975_v11 = vpop.xlane.xlu0 %974 }
 0x85d   : > { %v976_v12 = vmul.f32 %v975_v11, %v1782_v61 }
 0x85f   : > { %v977_v14 = vadd.f32 1e-05, %v976_v12 }
 0x861   : > { %1375 = vrsqrt.f32 %v977_v14  ;;  %vm984_vm5 = vweird.f32 %v977_v14 }
 0x867   : > { %v1376_v16 = vpop.eup %1375 }
 0x868   : > { %v979_v17 = vmul.f32 %v1376_v16, %v977_v14  ;;  %vm985_vm4 = vweird.f32 %v1376_v16 }
 0x869   : > { %vm986_vm6 = vmor %vm984_vm5, %vm985_vm4 }
 0x86a   : > { %v980_v18 = vmul.f32 %v1376_v16, %v979_v17 }
 0x86c   : > { %v981_v19 = vmul.f32 0.5, %v980_v18 }
 0x86e   : > { %v982_v20 = vsub.f32 1.5, %v981_v19 }
 0x870   : > { %v983_v21 = vmul.f32 %v1376_v16, %v982_v20 }
 0x872   : > { %v987_v23 = vsel %vm986_vm6, %v1376_v16, %v983_v21 }
 0x873   : > { %v988_v24 = vmul.f32 %v987_v23, %v971_v0 }
 0x875   : > { %v993_v26 = vmul.f32 %v1351_v22, %v988_v24 }
 0x877   : > { %v998_v27 = vadd.f32 %v1352_v25, %v993_v26 }
 0x879   : > { %1274 = vmatmul.msk.f32.vlgmr.msrb.gmra.mxu3 %vm505_vm0, %v998_v27 }
 0x8fc   : > { %v1027_v32 = vpop.f32.mrf.mxu3 }
 0x8fd   : > { %v1028_v33 = vadd.f32 %v1353_v31, %v1027_v32 }
 0x8ff   : > { %v1030_v34 = vmax.f32 %v1028_v33, 0.0 }
 0x901   : > { %1275 = vmatmul.msk.f32.vlgmr.msra.gmra.mxu1 %vm1043_vm7, %v1030_v34 }
 0x97e   : > { %v1064_v36 = vpop.f32.mrf.mxu1 }
 0x97f   : > { %v1065_v37 = vadd.f32 %v1354_v35, %v1064_v36 }
 0x981   : > { %v1067_v7 = vadd.f32 %v1065_v37, %v998_v27 }
 0x983   : > { %v1068_v38 = vsel %vm505_vm0, %v1067_v7, 0.0 }
 0x984   : > { %1069 = vadd.xlane.f32.xlu1 %v1068_v38 }
 0x9f7   : > { %v1070_v39 = vpop.xlane.xlu1 %1069 }
 0x9f8   : > { %v1071_v40 = vmul.f32 %v1070_v39, %v1782_v61 }
 0x9fa   : > { %v1072_v41 = vsub.f32 %v1067_v7, %v1071_v40 }
 0x9fc   : > { %v1073_v42 = vmul.f32 %v1072_v41, %v1072_v41 }
 0x9fe   : > { %v1074_v43 = vsel %vm505_vm0, %v1073_v42, 0.0 }
 0x9ff   : > { %1075 = vadd.xlane.f32.xlu2 %v1074_v43 }
 0xa00   : > { %1436 = shalt.err (!%p1433_p4)
}
 0xa01   : > { %s1521_s15 = smov 128   ;;  %s1522_s19 = smov 8  }
 0xa02   : > { %1287 = dma.vmem_to_hbm [thread:$0]  (%p1648_p11), %s1134_s18, 512, %s1136_s28, %s1107_s20, %s1521_s15, %s1521_s15, %s1522_s19  }
 0xa03   : > { %s1278_s11 = sshll.u32 %s1619_s17, 3  ;;  %s1933_s26 = sld [smem:[#allocation16_spill]] }
 0xa04   : > { %s1934_s20 = sld [smem:[#allocation18_spill]]  ;;  %s1936_s17 = sshll.u32 %s1684_s27, 3 }
 0xa05   : > { %s1935_s29 = sld [smem:[#allocation17_spill]]  ;;  %s488_s23 = scalar_lea.vmem [#allocation5], %s1936_s17 }
 0xa06   : > { %s1119_s15 = sshll.u32 %s488_s23, 4  ;;  %s1102_s22 = scalar_lea.sflag [#allocation4], %s1684_s27  ;;  %s1120_s15 = int_to_ptr.vmem [resolvable:$true] %s1119_s15 }
 0xa09   : > { %v1355_v53 = vld [vmem:[%s1933_s26] ss:$0 sm:$0xff] }
 0xa0a   : > { %s1117_s21 = scalar_lea.hbm %s1934_s20, %s1278_s11  ;;  %s1457_s28 = scalar_lea.hbm %s1934_s20, 16 }
 0xa0b   : > { %v1356_v56 = vld [vmem:[%s1935_s29] ss:$0 sm:$0xff]  ;;  %s1121_s19 = sshll.u32 %s1117_s21, 4  ;;  %s1122_s19 = int_to_ptr.hbm [resolvable:$true] %s1121_s19 }
 0xa0c   : > { %s1451_s24 = sshra.s32 %s1122_s19, 4  ;;  %s1452_s24 = int_to_ptr.hbm [resolvable:$true] %s1451_s24 }
 0xa0d   : > { %s1453_s11 = scalar_lea.hbm %s1452_s24, 8  ;;  %p1458_p10 = scmp.lt.s32.totalorder %s1452_s24, %s1934_s20 }
 0xa0e   : > { %p1454_p7 = scmp.ne.s32.totalorder %s1452_s24, %s1453_s11  ;;  %p1459_p2 = scmp.lt.s32.totalorder %s1457_s28, %s1453_s11 }
 0xa10   : > { %p1455_p5 = pnand %p1454_p7, %p1648_p11  ;;  %p1460_p6 = por %p1459_p2, %p1458_p10 }
 0xa12   : > { %p1456_p8 = pneg %p1455_p5 }
 0xa14   : > { %p1461_p9 = pnand %p1460_p6, %p1456_p8 }
 0xa72   : > { %v1076_v44 = vpop.xlane.xlu2 %1075 }
 0xa73   : > { %v1077_v45 = vmul.f32 %v1076_v44, %v1782_v61 }
 0xa75   : > { %v1078_v46 = vadd.f32 1e-05, %v1077_v45 }
 0xa77   : > { %1377 = vrsqrt.f32 %v1078_v46  ;;  %vm1085_vm9 = vweird.f32 %v1078_v46 }
 0xa7d   : > { %v1378_v47 = vpop.eup %1377 }
 0xa7e   : > { %v1080_v48 = vmul.f32 %v1378_v47, %v1078_v46  ;;  %vm1086_vm8 = vweird.f32 %v1378_v47 }
 0xa7f   : > { %vm1087_vm10 = vmor %vm1085_vm9, %vm1086_vm8 }
 0xa80   : > { %v1081_v49 = vmul.f32 %v1378_v47, %v1080_v48 }
 0xa82   : > { %v1082_v50 = vmul.f32 0.5, %v1081_v49 }
 0xa84   : > { %v1083_v51 = vsub.f32 1.5, %v1082_v50 }
 0xa86   : > { %v1084_v52 = vmul.f32 %v1378_v47, %v1083_v51 }
 0xa88   : > { %v1088_v54 = vsel %vm1087_vm10, %v1378_v47, %v1084_v52 }
 0xa89   : > { %v1089_v55 = vmul.f32 %v1088_v54, %v1072_v41 }
 0xa8b   : > { %v1094_v57 = vmul.f32 %v1355_v53, %v1089_v55 }
 0xa8d   : > { %v1099_v58 = vadd.f32 %v1356_v56, %v1094_v57 }
 0xa8f   : > { %1100 = vst.msk [vmem:[%s488_s23] sm:$0xff] %vm505_vm0, %v1099_v58 }
 0xa90   : > { %1464 = shalt.err (!%p1461_p9)
}
 0xa91   : > { %1286 = dma.vmem_to_hbm [thread:$0]  (%p1648_p11), %s1120_s15, 128, %s1122_s19, %s1102_s22  }
 0xa92 PF: > { %s1937_s27 = sld [smem:[#allocation11_spill]]  ;;  %p1939_p13 = scmp.ge.s32.totalorder %s1507_s16, 2 }
 0xa94   : > { %p1295_p0 = pnand %p1939_p13, %p1652_p12 }
 0xa96   : > { %p1296_p1 = pneg %p1295_p0 }
 0xa98   : > { %s1150_s29 = sand.u32 1, %s1937_s27  }
 0xa99   : > { %s1151_s17 = scalar_lea.sflag [#allocation4], %s1150_s29 }
 0xa9a   : > { %1486 = dma.done.wait (%p1296_p1), %s1151_s17, 128  }
 0xa9b   : > { %1488 = vsyncadd (%p1296_p1), %s1151_s17, 4294967168  ;;  %s1161_s23 = scalar_lea.sflag [#allocation7], %s1150_s29 }
 0xa9c   : > { %1490 = dma.done.wait (%p1296_p1), %s1161_s23, 512  }
 0xa9d   : > { %1492 = vsyncadd (%p1296_p1), %s1161_s23, 4294966784  ;;  %s1940_s16 = sld [smem:[#allocation13_spill]]  ;;  %s1943_s29 = smov %s1499_s30 }
 0xa9e   : > { %s1941_s24 = sld [smem:[#allocation12_spill]] }
 0xa9f   : > { %s1942_s15 = sld [smem:[#allocation14_spill]] }
 0xaa3   : > { %p31_p11 = scmp.ge.s32.totalorder %s1940_s16, 4  }
 0xaa4   : > { %s1944_s30 = smov %s1941_s24 }
 0xaa5   :  { %33 = sbr.rel (!%p31_p11) target bundleno = 11 (0xb), region = 140 }
 0xaaa   :  { %1167 = vsyncpa [#allocation3], 1 }
 0xaab   :  { %1169 = vsyncpa [#allocation3 + $0x1], 1 }
 0xaac   :  { %1170 = vsyncpa [#allocation4], 1 }
 0xaad   :  { %1172 = vsyncpa [#allocation4 + $0x1], 1 }
 0xaae   :  { %1173 = vsyncpa [#allocation7], 1 }
 0xaaf   :  { %1175 = vsyncpa [#allocation7 + $0x1], 1 }

</bundles_post_ra>
